<compile_context>
chip_gen: v7x
topology: tpu7x:2x2x1
jax: 0.10.0
libtpu: 0.0.40
codegen_flags: <defaults>
</compile_context>

<pallas_src>
import math
import functools

import jax
import jax.numpy as jnp
from jax.experimental import pallas as pl
from jax.experimental.pallas import tpu as pltpu


def _round_up(v, m):
    return ((v + m - 1) // m) * m


def _choose_tile(dim, target, granule):
    """Largest multiple of `granule` <= target that divides round_up(dim, granule).

    Keeps tiles lane/sublane aligned while avoiding padding blow-up on awkward
    feature dims (e.g. N=640 with a fixed tn=512 would pad to 1024).
    """
    padded = _round_up(dim, granule)
    best = granule
    t = granule
    hi = min(target, padded)
    while t <= hi:
        if padded % t == 0:
            best = t
        t += granule
    return best


def _lora_tiled_kernel(x_ref, wo_ref, bo_ref, wd_ref, wu_ref, o_ref,
                       acc_ref, down_ref):
    """One (i, j) output tile, accumulated over the K grid axis (axis 2).

    acc_ref  : (tm, tn) f32  -- org-path accumulator (reset every (i, j) tile)
    down_ref : (tm, Rp) f32  -- LoRA down accumulator (computed on j==0, reused for j>0)

    multiplier*scale is pre-folded into wu_ref, so no epilogue scaling here.
    """
    j = pl.program_id(1)
    k = pl.program_id(2)

    @pl.when(k == 0)
    def _():
        acc_ref[...] = jnp.zeros_like(acc_ref)

    @pl.when(jnp.logical_and(j == 0, k == 0))
    def _():
        down_ref[...] = jnp.zeros_like(down_ref)

    x = x_ref[...]  # bf16 (tm, tk)
    acc_ref[...] += jnp.dot(x, wo_ref[...], preferred_element_type=jnp.float32)

    @pl.when(j == 0)
    def _():
        # j-invariant LoRA down-projection: only computed on the first j sweep.
        down_ref[...] += jnp.dot(x, wd_ref[...], preferred_element_type=jnp.float32)

    @pl.when(k == pl.num_programs(2) - 1)
    def _():
        # Up-projection + bias happen exactly once per (i, j) tile.
        up = jnp.dot(down_ref[...].astype(jnp.bfloat16), wu_ref[...],
                     preferred_element_type=jnp.float32)
        o_ref[...] = (acc_ref[...] + bo_ref[...] + up).astype(o_ref.dtype)


def make_lora_forward(w_org, b_org, w_down, w_up, *, multiplier, scale,
                      tm_target=512, tn_target=512, tk_target=1024,
                      out_dtype=None):
    """One-time weight prep + jitted forward closure.

    w_org   : (in, out)   org Linear weight (row-major "x @ W" layout)
    b_org   : (out,)      org Linear bias
    w_down  : (in, r)     lora_down weight
    w_up    : (r, out)    lora_up weight
    forward(x): x is (B, S, in) -> (B, S, out)
    """
    K, N = w_org.shape
    R = w_down.shape[1]

    tn = _choose_tile(N, tn_target, 128)
    tk = _choose_tile(K, tk_target, 128)
    Np = _round_up(N, tn)
    Kp = _round_up(K, tk)
    Rp = max(128, _round_up(R, 128))  # never pad the rank beyond one MXU lane pass

    mult_scale = float(multiplier) * float(scale)

    # --- one-time pad + cast (zero-fill pads keep the math unchanged) ---
    w_org_p = jnp.pad(w_org.astype(jnp.bfloat16), ((0, Kp - K), (0, Np - N)))
    b_p = jnp.pad(b_org.astype(jnp.float32), (0, Np - N)).reshape(1, Np)
    w_down_p = jnp.pad(w_down.astype(jnp.bfloat16), ((0, Kp - K), (0, Rp - R)))
    # Fold multiplier*scale into the cached bf16 up-projection weight.
    w_up_p = jnp.pad((w_up.astype(jnp.float32) * mult_scale).astype(jnp.bfloat16),
                     ((0, Rp - R), (0, Np - N)))

    @jax.jit
    def forward(x):
        B, S, Kin = x.shape
        assert Kin == K, f"expected in_features={K}, got {Kin}"
        M = B * S
        odt = x.dtype if out_dtype is None else out_dtype

        tm = _choose_tile(M, tm_target, 16)   # bf16 sublane packing = 16 rows
        Mp = _round_up(M, tm)

        x2d = jnp.pad(x.reshape(M, K).astype(jnp.bfloat16),
                      ((0, Mp - M), (0, Kp - K)))

        grid = (Mp // tm, Np // tn, Kp // tk)

        # VMEM limit from the actual double-buffered footprint (+ headroom),
        # capped well under v7x's 64 MiB physical VMEM.
        out_bytes = jnp.dtype(odt).itemsize
        footprint = 2 * (tm * tk * 2 + tk * tn * 2 + tn * 4
                         + tk * Rp * 2 + Rp * tn * 2 + tm * tn * out_bytes)
        footprint += tm * tn * 4 + tm * Rp * 4
        vmem_limit = min(max(2 * footprint + (8 << 20), 16 << 20), 48 << 20)

        out2d = pl.pallas_call(
            _lora_tiled_kernel,
            out_shape=jax.ShapeDtypeStruct((Mp, Np), odt),
            grid_spec=pltpu.PrefetchScalarGridSpec(
                num_scalar_prefetch=0,
                grid=grid,
                in_specs=[
                    pl.BlockSpec((tm, tk), lambda i, j, k: (i, k)),    # x
                    pl.BlockSpec((tk, tn), lambda i, j, k: (k, j)),    # W_org (in, out)
                    pl.BlockSpec((1, tn), lambda i, j, k: (0, j)),     # bias (f32)
                    # W_down only needed on the j==0 sweep; keep the block index
                    # constant for j>0 so it is not re-streamed from HBM.
                    pl.BlockSpec((tk, Rp),
                                 lambda i, j, k: (jnp.where(j == 0, k, 0), 0)),
                    pl.BlockSpec((Rp, tn), lambda i, j, k: (0, j)),    # W_up (r, out)
                ],
                out_specs=pl.BlockSpec((tm, tn), lambda i, j, k: (i, j)),
                scratch_shapes=[
                    pltpu.VMEM((tm, tn), jnp.float32),   # org accumulator
                    pltpu.VMEM((tm, Rp), jnp.float32),   # LoRA down accumulator
                ],
            ),
            compiler_params=pltpu.CompilerParams(
                # Only M is parallel: j/k must stay on one core so the persistent
                # down_ref reuse across j tiles is correct (v7x 2-TC sharding by i).
                dimension_semantics=("parallel", "arbitrary", "arbitrary"),
                vmem_limit_bytes=int(vmem_limit),
            ),
        )(x2d, w_org_p, b_p, w_down_p, w_up_p)

        return out2d[:M, :N].reshape(B, S, N)

    return forward


def _reference(x, w_org, b_org, w_down, w_up, multiplier, scale):
    org = jnp.einsum("bsk,kn->bsn", x, w_org) + b_org
    lora = jnp.einsum("bsr,rn->bsn", jnp.einsum("bsk,kr->bsr", x, w_down), w_up)
    return org + lora * multiplier * scale


def _reference_bf16_emulated(x, w_org, b_org, w_down, w_up, multiplier, scale):
    """Mirrors the kernel's numerics: bf16 operands, f32 accumulation, bf16 down,
    multiplier*scale folded into bf16 W_up."""
    def _bf(a):
        return a.astype(jnp.bfloat16).astype(jnp.float32)
    org = jnp.einsum("bsk,kn->bsn", _bf(x), _bf(w_org)) + b_org.astype(jnp.float32)
    down = jnp.einsum("bsk,kr->bsr", _bf(x), _bf(w_down))
    down = down.astype(jnp.bfloat16).astype(jnp.float32)
    w_up_s = _bf(w_up.astype(jnp.float32) * (multiplier * scale))
    return org + jnp.einsum("bsr,rn->bsn", down, w_up_s)


def _make_linear_params(key, in_f, out_f, lora_dim, dtype):
    kwo, kbo, kwd, kwu = jax.random.split(key, 4)
    bound_org = 1.0 / math.sqrt(in_f)
    w_org = jax.random.uniform(kwo, (in_f, out_f), dtype=dtype,
                               minval=-bound_org, maxval=bound_org)
    b_org = jax.random.uniform(kbo, (out_f,), dtype=dtype,
                               minval=-bound_org, maxval=bound_org)
    # lora_down: kaiming_uniform_(a=sqrt(5)) on (lora_dim, in) -> bound = 1/sqrt(in).
    w_down = jax.random.uniform(kwd, (in_f, lora_dim), dtype=dtype,
                                minval=-bound_org, maxval=bound_org)
    # lora_up is zero-init in the module; use random values here so the LoRA
    # path (up matmul, scale fold, casts) is actually validated.
    bound_up = 1.0 / math.sqrt(lora_dim)
    w_up = jax.random.uniform(kwu, (lora_dim, out_f), dtype=dtype,
                              minval=-bound_up, maxval=bound_up)
    return w_org, b_org, w_down, w_up


if __name__ == "__main__":
    dtype = jnp.float32
    key = jax.random.PRNGKey(0)
    k1, k2, k3, k4 = jax.random.split(key, 4)

    # ---------------- Test 1: module defaults, single-tile grid ----------------
    in_features, out_features, lora_dim, alpha = 32, 32, 4, 1.0
    multiplier, scale = 1.0, alpha / lora_dim
    batch, seq = 2, 8

    x = jax.random.normal(k1, (batch, seq, in_features), dtype=dtype)
    w_org, b_org, w_down, w_up = _make_linear_params(k2, in_features, out_features,
                                                     lora_dim, dtype)

    fwd = make_lora_forward(w_org, b_org, w_down, w_up,
                            multiplier=multiplier, scale=scale)
    out = jax.block_until_ready(fwd(x))

    ref_bf = _reference_bf16_emulated(x, w_org, b_org, w_down, w_up, multiplier, scale)
    ref_f32 = _reference(x, w_org, b_org, w_down, w_up, multiplier, scale)
    assert out.shape == (batch, seq, out_features)
    assert jnp.allclose(out, ref_bf, atol=2e-2, rtol=2e-2), "T1 mismatch vs bf16 reference"
    assert jnp.allclose(out, ref_f32, atol=6e-2, rtol=6e-2), "T1 mismatch vs f32 reference"

    # ------- Test 2: multi-tile grid (exercises k-accum, j==0 down reuse) -------
    in2, out2, lora_dim2 = 256, 256, 4
    mult2, scale2 = 0.7, 2.0 / lora_dim2
    b2, s2 = 2, 16   # M=32 -> 2 i-tiles with tm_target=16

    x2 = jax.random.normal(k3, (b2, s2, in2), dtype=dtype)
    w_org2, b_org2, w_down2, w_up2 = _make_linear_params(k4, in2, out2, lora_dim2, dtype)

    fwd2 = make_lora_forward(w_org2, b_org2, w_down2, w_up2,
                             multiplier=mult2, scale=scale2,
                             tm_target=16, tn_target=128, tk_target=128)
    out_2 = jax.block_until_ready(fwd2(x2))

    ref2_bf = _reference_bf16_emulated(x2, w_org2, b_org2, w_down2, w_up2, mult2, scale2)
    ref2_f32 = _reference(x2, w_org2, b_org2, w_down2, w_up2, mult2, scale2)
    assert out_2.shape == (b2, s2, out2)
    assert jnp.allclose(out_2, ref2_bf, atol=2e-2, rtol=2e-2), "T2 mismatch vs bf16 reference"
    assert jnp.allclose(out_2, ref2_f32, atol=1e-1, rtol=1e-1), "T2 mismatch vs f32 reference"

    print("KERNEL_OK")
</pallas_src>

<mosaic_0001>
module attributes {stable_mosaic.version = 11 : i64} {
  func.func @_lora_tiled_kernel(%arg0: i32, %arg1: i32, %arg2: i32, %arg3: memref<16x128xbf16, #tpu.memory_space<vmem>>, %arg4: memref<128x128xbf16, #tpu.memory_space<vmem>>, %arg5: memref<1x128xf32, #tpu.memory_space<vmem>>, %arg6: memref<128x128xbf16, #tpu.memory_space<vmem>>, %arg7: memref<128x128xbf16, #tpu.memory_space<vmem>>, %arg8: memref<16x128xf32, #tpu.memory_space<vmem>>, %arg9: memref<16x128xf32, #tpu.memory_space<vmem>>, %arg10: memref<16x128xf32, #tpu.memory_space<vmem>>) attributes {dimension_semantics = [#tpu.dimension_semantics<parallel>, #tpu.dimension_semantics<arbitrary>, #tpu.dimension_semantics<arbitrary>], iteration_bounds = array<i64: 1, 1, 1>, scalar_prefetch = 0 : i64, scratch_operands = 2 : i64, tpu.core_type = #tpu.core_type<tc>, window_params = [{transform_indices = @transform_0, window_bounds = array<i64: 16, 128>}, {transform_indices = @transform_1, window_bounds = array<i64: 128, 128>}, {transform_indices = @transform_2, window_bounds = array<i64: 1, 128>}, {transform_indices = @transform_3, window_bounds = array<i64: 128, 128>}, {transform_indices = @transform_4, window_bounds = array<i64: 128, 128>}, {transform_indices = @transform_5, window_bounds = array<i64: 16, 128>}]} {
    %c0_i32 = arith.constant 0 : i32
    %0 = arith.cmpi eq, %arg2, %c0_i32 : i32
    %1 = arith.extui %0 : i1 to i32
    %c0_i32_0 = arith.constant 0 : i32
    %2 = arith.cmpi ne, %1, %c0_i32_0 : i32
    scf.if %2 {
      %cst_15 = arith.constant 0.000000e+00 : f32
      %20 = vector.broadcast %cst_15 : f32 to vector<16x128xf32>
      %c0_16 = arith.constant 0 : index
      %c0_17 = arith.constant 0 : index
      %21 = vector.load %arg9[%c0_16, %c0_17] : memref<16x128xf32, #tpu.memory_space<vmem>>, vector<16x128xf32>
      tpu.vector_store %arg9[%c0_16, %c0_17], %20 {strides = array<i32>} : memref<16x128xf32, #tpu.memory_space<vmem>>, vector<16x128xf32>,
    } else {
    }
    %c0_i32_1 = arith.constant 0 : i32
    %3 = arith.cmpi eq, %arg1, %c0_i32_1 : i32
    %c0_i32_2 = arith.constant 0 : i32
    %4 = arith.cmpi eq, %arg2, %c0_i32_2 : i32
    %5 = arith.andi %3, %4 : i1
    %6 = arith.extui %5 : i1 to i32
    %c0_i32_3 = arith.constant 0 : i32
    %7 = arith.cmpi ne, %6, %c0_i32_3 : i32
    scf.if %7 {
      %cst_15 = arith.constant 0.000000e+00 : f32
      %20 = vector.broadcast %cst_15 : f32 to vector<16x128xf32>
      %c0_16 = arith.constant 0 : index
      %c0_17 = arith.constant 0 : index
      %21 = vector.load %arg10[%c0_16, %c0_17] : memref<16x128xf32, #tpu.memory_space<vmem>>, vector<16x128xf32>
      tpu.vector_store %arg10[%c0_16, %c0_17], %20 {strides = array<i32>} : memref<16x128xf32, #tpu.memory_space<vmem>>, vector<16x128xf32>,
    } else {
    }
    %c0 = arith.constant 0 : index
    %c0_4 = arith.constant 0 : index
    %8 = vector.load %arg3[%c0, %c0_4] : memref<16x128xbf16, #tpu.memory_space<vmem>>, vector<16x128xbf16>
    %c0_5 = arith.constant 0 : index
    %c0_6 = arith.constant 0 : index
    %9 = vector.load %arg9[%c0_5, %c0_6] : memref<16x128xf32, #tpu.memory_space<vmem>>, vector<16x128xf32>
    %c0_7 = arith.constant 0 : index
    %c0_8 = arith.constant 0 : index
    %10 = vector.load %arg4[%c0_7, %c0_8] : memref<128x128xbf16, #tpu.memory_space<vmem>>, vector<128x128xbf16>
    %cst = arith.constant dense<0.000000e+00> : vector<16x128xf32>
    %11 = tpu.matmul %8, %10, %cst {dimension_numbers = #tpu.dot_dimension_numbers<[1], [0], [0], [1], [0, 0, 1, 1], [], []>} : vector<16x128xbf16>, vector<128x128xbf16>, vector<16x128xf32> -> vector<16x128xf32>
    %12 = arith.addf %9, %11 : vector<16x128xf32>
    %c0_9 = arith.constant 0 : index
    %c0_10 = arith.constant 0 : index
    %13 = vector.load %arg9[%c0_9, %c0_10] : memref<16x128xf32, #tpu.memory_space<vmem>>, vector<16x128xf32>
    tpu.vector_store %arg9[%c0_9, %c0_10], %12 {strides = array<i32>} : memref<16x128xf32, #tpu.memory_space<vmem>>, vector<16x128xf32>,
    %c0_i32_11 = arith.constant 0 : i32
    %14 = arith.cmpi eq, %arg1, %c0_i32_11 : i32
    %15 = arith.extui %14 : i1 to i32
    %c0_i32_12 = arith.constant 0 : i32
    %16 = arith.cmpi ne, %15, %c0_i32_12 : i32
    scf.if %16 {
      %c0_15 = arith.constant 0 : index
      %c0_16 = arith.constant 0 : index
      %20 = vector.load %arg10[%c0_15, %c0_16] : memref<16x128xf32, #tpu.memory_space<vmem>>, vector<16x128xf32>
      %c0_17 = arith.constant 0 : index
      %c0_18 = arith.constant 0 : index
      %21 = vector.load %arg6[%c0_17, %c0_18] : memref<128x128xbf16, #tpu.memory_space<vmem>>, vector<128x128xbf16>
      %cst_19 = arith.constant dense<0.000000e+00> : vector<16x128xf32>
      %22 = tpu.matmul %8, %21, %cst_19 {dimension_numbers = #tpu.dot_dimension_numbers<[1], [0], [0], [1], [0, 0, 1, 1], [], []>} : vector<16x128xbf16>, vector<128x128xbf16>, vector<16x128xf32> -> vector<16x128xf32>
      %23 = arith.addf %20, %22 : vector<16x128xf32>
      %c0_20 = arith.constant 0 : index
      %c0_21 = arith.constant 0 : index
      %24 = vector.load %arg10[%c0_20, %c0_21] : memref<16x128xf32, #tpu.memory_space<vmem>>, vector<16x128xf32>
      tpu.vector_store %arg10[%c0_20, %c0_21], %23 {strides = array<i32>} : memref<16x128xf32, #tpu.memory_space<vmem>>, vector<16x128xf32>,
    } else {
    }
    %c0_i32_13 = arith.constant 0 : i32
    %17 = arith.cmpi eq, %arg2, %c0_i32_13 : i32
    %18 = arith.extui %17 : i1 to i32
    %c0_i32_14 = arith.constant 0 : i32
    %19 = arith.cmpi ne, %18, %c0_i32_14 : i32
    scf.if %19 {
      %c0_15 = arith.constant 0 : index
      %c0_16 = arith.constant 0 : index
      %20 = vector.load %arg10[%c0_15, %c0_16] : memref<16x128xf32, #tpu.memory_space<vmem>>, vector<16x128xf32>
      %21 = arith.truncf %20 : vector<16x128xf32> to vector<16x128xbf16>
      %c0_17 = arith.constant 0 : index
      %c0_18 = arith.constant 0 : index
      %22 = vector.load %arg7[%c0_17, %c0_18] : memref<128x128xbf16, #tpu.memory_space<vmem>>, vector<128x128xbf16>
      %cst_19 = arith.constant dense<0.000000e+00> : vector<16x128xf32>
      %23 = tpu.matmul %21, %22, %cst_19 {dimension_numbers = #tpu.dot_dimension_numbers<[1], [0], [0], [1], [0, 0, 1, 1], [], []>} : vector<16x128xbf16>, vector<128x128xbf16>, vector<16x128xf32> -> vector<16x128xf32>
      %c0_20 = arith.constant 0 : index
      %c0_21 = arith.constant 0 : index
      %24 = vector.load %arg9[%c0_20, %c0_21] : memref<16x128xf32, #tpu.memory_space<vmem>>, vector<16x128xf32>
      %c0_22 = arith.constant 0 : index
      %c0_23 = arith.constant 0 : index
      %25 = vector.load %arg5[%c0_22, %c0_23] : memref<1x128xf32, #tpu.memory_space<vmem>>, vector<1x128xf32>
      %26 = vector.broadcast %25 : vector<1x128xf32> to vector<16x128xf32>
      %27 = arith.addf %24, %26 : vector<16x128xf32>
      %28 = arith.addf %27, %23 : vector<16x128xf32>
      %c0_24 = arith.constant 0 : index
      %c0_25 = arith.constant 0 : index
      %29 = vector.load %arg8[%c0_24, %c0_25] : memref<16x128xf32, #tpu.memory_space<vmem>>, vector<16x128xf32>
      tpu.vector_store %arg8[%c0_24, %c0_25], %28 {strides = array<i32>} : memref<16x128xf32, #tpu.memory_space<vmem>>, vector<16x128xf32>,
    } else {
    }
    return
  }
  func.func @transform_0(%arg0: i32, %arg1: i32, %arg2: i32) -> (i32, i32) {
    %c0_i32 = arith.constant 0 : i32
    return %arg0, %arg2 : i32, i32
  }
  func.func @transform_1(%arg0: i32, %arg1: i32, %arg2: i32) -> (i32, i32) {
    %c0_i32 = arith.constant 0 : i32
    return %arg2, %arg1 : i32, i32
  }
  func.func @transform_2(%arg0: i32, %arg1: i32, %arg2: i32) -> (i32, i32) {
    %c0_i32 = arith.constant 0 : i32
    %c0_i32_0 = arith.constant 0 : i32
    return %c0_i32, %arg1 : i32, i32
  }
  func.func @transform_3(%arg0: i32, %arg1: i32, %arg2: i32) -> (i32, i32) {
    %c0_i32 = arith.constant 0 : i32
    %0 = arith.cmpi eq, %arg1, %c0_i32 : i32
    %c0_i32_0 = arith.constant 0 : i32
    %1 = arith.select %0, %arg2, %c0_i32_0 : i32
    %c0_i32_1 = arith.constant 0 : i32
    %c0_i32_2 = arith.constant 0 : i32
    return %1, %c0_i32_1 : i32, i32
  }
  func.func @transform_4(%arg0: i32, %arg1: i32, %arg2: i32) -> (i32, i32) {
    %c0_i32 = arith.constant 0 : i32
    %c0_i32_0 = arith.constant 0 : i32
    return %c0_i32, %arg1 : i32, i32
  }
  func.func @transform_5(%arg0: i32, %arg1: i32, %arg2: i32) -> (i32, i32) {
    %c0_i32 = arith.constant 0 : i32
    return %arg0, %arg1 : i32, i32
  }
}

</mosaic_0001>

<bundles_post_ra>
// kernel: forward.1
= control target key start
LH: loop header
LB: loop body
LE: loop exit
PB: predicated region body
PF: predicated region fallthrough
CT: control target
= control target key end

     0   :  { %10 = vsyncpa [#allocation5], 0  ;;  %s761_s0 = inlined_call_operand.vmem [shape: bf16[16,128], index: 0, kind: input, shape index: {}]   ;;  %s762_s1 = inlined_call_operand.hbm [shape: bf16[128,128], index: 1, kind: input, shape index: {}]   ;;  %s763_s2 = inlined_call_operand.vmem [shape: f32[1,128], index: 2, kind: input, shape index: {}]   ;;  %s764_s3 = inlined_call_operand.hbm [shape: bf16[128,128], index: 3, kind: input, shape index: {}]   ;;  %s765_s4 = inlined_call_operand.vmem [shape: bf16[128,128], index: 4, kind: input, shape index: {}]   ;;  %s766_s5 = inlined_call_operand.vmem [shape: f32[16,128], index: 5, kind: output, shape index: {}]  }
   0x1   :  { %11 = vsyncpa [#allocation7], 0  ;;  %s635_s18 = smov [#allocation4]   ;;  %s587_s22 = scalar_lea.hbm %s762_s1, 1024 }
   0x2   :  { %s19_s19 = sshll.u32 %s635_s18, 4  ;;  %p588_p0 = scmp.ne.s32.totalorder %s762_s1, %s587_s22  ;;  %s20_s19 = int_to_ptr.vmem [resolvable:$true] %s19_s19 }
   0x3   :  { %p591_p1 = scmp.lt.u32.totalorder %s587_s22, %s762_s1 }
   0x5   :  { %p593_p2 = pnand %p591_p1, %p588_p0 }
   0x7   :  { %596 = shalt.err (!%p593_p2)
}
   0x8   :  { %s597_s27 = scalar_lea.vmem %s20_s19, 1024  ;;  %p602_p4 = scmp.lt.s32.totalorder %s20_s19, %s20_s19 }
   0x9   :  { %p598_p3 = scmp.ne.s32.totalorder %s20_s19, %s597_s27  ;;  %p603_p5 = scmp.lt.s32.totalorder %s597_s27, %s597_s27 }
   0xb   :  { %p604_p6 = por %p603_p5, %p602_p4 }
   0xd   :  { %p605_p7 = pnand %p604_p6, %p598_p3 }
   0xf   :  { %608 = shalt.err (!%p605_p7)
}
  0x10   :  { %s636_s28 = smov 64   ;;  %s637_s29 = smov 4  }
  0x11   :  { %25 = dma.hbm_to_vmem [thread:$0]  %s762_s1, 1024, %s20_s19, [#allocation5], %s636_s28, %s636_s28, %s637_s29  }
  0x12   :  { %s638_s7 = smov [#allocation6]   ;;  %s609_s11 = scalar_lea.hbm %s764_s3, 1024 }
  0x13   :  { %s38_s8 = sshll.u32 %s638_s7, 4  ;;  %p610_p8 = scmp.ne.s32.totalorder %s764_s3, %s609_s11  ;;  %s39_s8 = int_to_ptr.vmem [resolvable:$true] %s38_s8 }
  0x14   :  { %p613_p9 = scmp.lt.u32.totalorder %s609_s11, %s764_s3 }
  0x16   :  { %p615_p10 = pnand %p613_p9, %p610_p8 }
  0x18   :  { %618 = shalt.err (!%p615_p10)
}
  0x19   :  { %s619_s16 = scalar_lea.vmem %s39_s8, 1024  ;;  %p624_p12 = scmp.lt.s32.totalorder %s39_s8, %s39_s8 }
  0x1a   :  { %p620_p11 = scmp.ne.s32.totalorder %s39_s8, %s619_s16  ;;  %p625_p13 = scmp.lt.s32.totalorder %s619_s16, %s619_s16 }
  0x1c   :  { %p626_p0 = por %p625_p13, %p624_p12 }
  0x1e   :  { %p627_p1 = pnand %p626_p0, %p620_p11 }
  0x20   :  { %630 = shalt.err (!%p627_p1)
}
  0x21   :  { %44 = dma.hbm_to_vmem [thread:$0]  %s764_s3, 1024, %s39_s8, [#allocation7], %s636_s28, %s636_s28, %s637_s29  }
  0x22   :  { %631 = dma.done.wait [#allocation5], 1024  }
  0x23   :  { %632 = vsyncadd [#allocation5], 4294966272 }
  0x24   :  { %633 = dma.done.wait [#allocation7], 1024  }
  0x25   :  { %634 = vsyncadd [#allocation7], 4294966272  ;;  %v639_v0 = vmov 0.0   ;;  %vm640_vm0 = vmmov 0   ;;  %v562_v1 = vld [vmem:[#allocation6] sm:$0xff]   ;;  %v563_v2 = vld [vmem:[#allocation6 + $0x8] sm:$0xff]  }
  0x26   :  { %510 = vmatprep.subr.bf16.mxu1 %v639_v0  ;;  %526 = vmatprep.mubr.msk.bf16.mxu1 %vm640_vm0, %v639_v0  ;;  %v564_v3 = vld [vmem:[#allocation6 + $0x10] sm:$0xff]   ;;  %v571_v4 = vld [vmem:[#allocation4] sm:$0xff]   ;;  %v565_v5 = vld [vmem:[#allocation6 + $0x18] sm:$0xff]  }
  0x27   :  { %490 = vmatprep.subr.bf16.mxu0 %v639_v0  ;;  %506 = vmatprep.mubr.msk.bf16.mxu0 %vm640_vm0, %v639_v0  ;;  %v572_v6 = vld [vmem:[#allocation4 + $0x8] sm:$0xff]   ;;  %v566_v7 = vld [vmem:[#allocation6 + $0x20] sm:$0xff]   ;;  %v573_v8 = vld [vmem:[#allocation4 + $0x10] sm:$0xff]  }
  0x28   :  { %511 = vmatpush3.bf16.msra.mxu1 %v562_v1  ;;  %491 = vmatpush3.bf16.msra.mxu0 %v571_v4  ;;  %v567_v9 = vld [vmem:[#allocation6 + $0x28] sm:$0xff]   ;;  %v574_v10 = vld [vmem:[#allocation4 + $0x18] sm:$0xff]   ;;  %v568_v11 = vld [vmem:[#allocation6 + $0x30] sm:$0xff]  }
  0x29   :  { %512 = vmatprep.subr.bf16.mxu1 %v639_v0  ;;  %492 = vmatprep.subr.bf16.mxu0 %v639_v0  ;;  %v575_v12 = vld [vmem:[#allocation4 + $0x20] sm:$0xff]   ;;  %v569_v13 = vld [vmem:[#allocation6 + $0x38] sm:$0xff]   ;;  %v576_v14 = vld [vmem:[#allocation4 + $0x28] sm:$0xff]  }
  0x2a   :  { %v570_v15 = vld [vmem:[%s761_s0] sm:$0xff]   ;;  %v577_v16 = vld [vmem:[#allocation4 + $0x30] sm:$0xff]   ;;  %v578_v17 = vld [vmem:[#allocation4 + $0x38] sm:$0xff]  }
  0x2b   :  { %v579_v18 = vld [vmem:[%s765_s4] sm:$0xff]   ;;  %v580_v19 = vld [vmem:[%s765_s4 + $0x8] sm:$0xff]   ;;  %v581_v20 = vld [vmem:[%s765_s4 + $0x10] sm:$0xff]  }
  0x2c   :  { %513 = vmatpush3.bf16.msra.mxu1 %v563_v2  ;;  %493 = vmatpush3.bf16.msra.mxu0 %v572_v6  ;;  %v582_v21 = vld [vmem:[%s765_s4 + $0x18] sm:$0xff]   ;;  %v583_v22 = vld [vmem:[%s765_s4 + $0x20] sm:$0xff]   ;;  %v584_v23 = vld [vmem:[%s765_s4 + $0x28] sm:$0xff]  }
  0x2d   :  { %514 = vmatprep.subr.bf16.mxu1 %v639_v0  ;;  %494 = vmatprep.subr.bf16.mxu0 %v639_v0  ;;  %v585_v24 = vld [vmem:[%s765_s4 + $0x30] sm:$0xff]   ;;  %v586_v25 = vld [vmem:[%s765_s4 + $0x38] sm:$0xff]   ;;  %v462_v31 = vld [vmem:[%s763_s2] ss:$0 sm:$0xff] }
  0x30   :  { %515 = vmatpush3.bf16.msra.mxu1 %v564_v3  ;;  %495 = vmatpush3.bf16.msra.mxu0 %v573_v8 }
  0x31   :  { %516 = vmatprep.subr.bf16.mxu1 %v639_v0  ;;  %496 = vmatprep.subr.bf16.mxu0 %v639_v0 }
  0x34   :  { %517 = vmatpush3.bf16.msra.mxu1 %v565_v5  ;;  %497 = vmatpush3.bf16.msra.mxu0 %v574_v10 }
  0x35   :  { %518 = vmatprep.subr.bf16.mxu1 %v639_v0  ;;  %498 = vmatprep.subr.bf16.mxu0 %v639_v0 }
  0x38   :  { %519 = vmatpush3.bf16.msra.mxu1 %v566_v7  ;;  %499 = vmatpush3.bf16.msra.mxu0 %v575_v12 }
  0x39   :  { %520 = vmatprep.subr.bf16.mxu1 %v639_v0  ;;  %500 = vmatprep.subr.bf16.mxu0 %v639_v0 }
  0x3c   :  { %521 = vmatpush3.bf16.msra.mxu1 %v567_v9  ;;  %501 = vmatpush3.bf16.msra.mxu0 %v576_v14 }
  0x3d   :  { %522 = vmatprep.subr.bf16.mxu1 %v639_v0  ;;  %502 = vmatprep.subr.bf16.mxu0 %v639_v0 }
  0x40   :  { %523 = vmatpush3.bf16.msra.mxu1 %v568_v11  ;;  %503 = vmatpush3.bf16.msra.mxu0 %v577_v16 }
  0x41   :  { %524 = vmatprep.subr.bf16.mxu1 %v639_v0  ;;  %504 = vmatprep.subr.bf16.mxu0 %v639_v0 }
  0x44   :  { %525 = vmatpush3.bf16.msra.mxu1 %v569_v13  ;;  %505 = vmatpush3.bf16.msra.mxu0 %v578_v17 }
  0x45   :  { %530 = vmatprep.subr.bf16.mxu0 %v639_v0 }
  0x47   :  { %527 = vmatmul.mubr.bf16.vlgmr.msra.gmra.mrb[0].mxu1 %v570_v15  ;;  %507 = vmatmul.mubr.bf16.vlgmr.msra.gmra.mrb[0].mxu0 %v570_v15 }
  0x48   :  { %531 = vmatpush3.bf16.msra.mxu0 %v579_v18  ;;  %546 = vmatprep.mubr.msk.bf16.mxu0 %vm640_vm0, %v639_v0 }
  0x49   :  { %532 = vmatprep.subr.bf16.mxu0 %v639_v0 }
  0x4c   :  { %533 = vmatpush3.bf16.msra.mxu0 %v580_v19 }
  0x4d   :  { %534 = vmatprep.subr.bf16.mxu0 %v639_v0 }
  0x50   :  { %535 = vmatpush3.bf16.msra.mxu0 %v581_v20 }
  0x51   :  { %536 = vmatprep.subr.bf16.mxu0 %v639_v0 }
  0x54   :  { %537 = vmatpush3.bf16.msra.mxu0 %v582_v21 }
  0x55   :  { %538 = vmatprep.subr.bf16.mxu0 %v639_v0 }
  0x58   :  { %539 = vmatpush3.bf16.msra.mxu0 %v583_v22 }
  0x59   :  { %540 = vmatprep.subr.bf16.mxu0 %v639_v0 }
  0x5c   :  { %541 = vmatpush3.bf16.msra.mxu0 %v584_v23 }
  0x5d   :  { %542 = vmatprep.subr.bf16.mxu0 %v639_v0 }
  0x60   :  { %543 = vmatpush3.bf16.msra.mxu0 %v585_v24 }
  0x61   :  { %544 = vmatprep.subr.bf16.mxu0 %v639_v0 }
  0x64   :  { %545 = vmatpush3.bf16.msra.mxu0 %v586_v25 }
 0x11a   :  { %v292_v26 = vpop.f32.mrb[0].mxu1 }
 0x11b   :  { %v528_v27 = vpop.f32.mrb[1].mxu1 }
 0x11c   :  { %v295_v28 = vpop.f32.mrb[2].mxu1 }
 0x11d   :  { %v308_v29 = vpack.c.bf16 %v295_v28, %v292_v26  ;;  %v529_v30 = vpop.f32.mrb[3].mxu1 }
 0x11f   :  { %547 = vmatmul.mubr.bf16.vlgmr.msra.gmra.mrb[0].mxu0 %v308_v29 }
 0x1f2   :  { %v407_v32 = vpop.f32.mrb[0].mxu0 }
 0x1f3   :  { %v550_v33 = vadd.f32 %v462_v31, %v407_v32  ;;  %v548_v34 = vpop.f32.mrb[1].mxu0 }
 0x1f4   :  { %v410_v35 = vpop.f32.mrb[2].mxu0 }
 0x1f5   :  { %427 = vst [vmem:[%s766_s5] sm:$0xff] %v550_v33  ;;  %v551_v36 = vadd.f32 %v462_v31, %v410_v35  ;;  %v549_v37 = vpop.f32.mrb[3].mxu0 }
 0x1f7   :  { %428 = vst [vmem:[%s766_s5 + $0x8] sm:$0xff] %v551_v36 }
 0x1f8   :  { %433 = vsyncpa [#allocation5], 1 }
 0x1f9   :  { %434 = vsyncpa [#allocation7], 1 }

</bundles_post_ra>
